<compile_context>
chip_gen: v6e
topology: v6e:2x2x1
jax: 0.10.0
libtpu: 0.0.40
codegen_flags: <defaults>
</compile_context>

<pallas_src>
import functools

import jax
import jax.numpy as jnp
from jax import lax
from jax.experimental import pallas as pl
from jax.experimental.pallas import tpu as pltpu


def _ce_kernel_pix(x_ref, t_ref, out_ref, *, n_rows, tile_rows, mask_tail):
    """Pixel-on-sublane path. Block: logits (1,C,R,128), labels (1,1,R,128)."""
    j = pl.program_id(1)

    x = x_ref[0]                              # (C, R, 128), native dtype
    t = t_ref[0, 0].astype(jnp.int32)         # (R, 128)
    C = x.shape[0]
    zero = jnp.zeros((), x.dtype)

    # Running max over class planes: elementwise across the leading axis (VPU).
    m = x[0]
    for c in range(1, C):
        m = jnp.maximum(m, x[c])

    # Streaming exp-sum (f32) and target-logit select; no (C,R,128) f32
    # intermediate is kept live and no iota is needed for the class compare.
    s = jnp.zeros(m.shape, jnp.float32)
    tgt = jnp.zeros(m.shape, x.dtype)
    for c in range(C):
        xc = x[c]
        s = s + jnp.exp((xc - m).astype(jnp.float32))
        tgt = tgt + jnp.where(t == c, xc, zero)

    loss = m.astype(jnp.float32) + jnp.log(s) - tgt.astype(jnp.float32)  # (R,128)

    if mask_tail:
        # Mask rows past the real pixel extent (select AFTER the math so any
        # garbage/NaN in the padded region is discarded, never propagated).
        row = j * tile_rows + lax.broadcasted_iota(jnp.int32, loss.shape, 0)
        loss = jnp.where(row < n_rows, loss, 0.0)

    out_ref[...] = jnp.reshape(jnp.sum(loss), (1, 1, 1, 1))


def _ce_kernel_cls(x_ref, t_ref, out_ref, *, hw, tile_px, mask_tail):
    """Fallback (H*W not a multiple of 128). Block: logits (1,C,T), labels (1,1,T)."""
    j = pl.program_id(1)

    x = x_ref[0]                              # (C, TILE_PX), native dtype
    t = t_ref[0].astype(jnp.int32)            # (1, TILE_PX)

    m = jnp.max(x, axis=0, keepdims=True)                              # (1, T)
    e = jnp.exp((x - m).astype(jnp.float32))                           # (C, T) f32
    lse = m.astype(jnp.float32) + jnp.log(jnp.sum(e, axis=0, keepdims=True))

    # (C, 1) iota broadcast against (1, T) labels — no full (C, T) iota.
    cls_ids = lax.broadcasted_iota(jnp.int32, (x.shape[0], 1), 0)
    tgt = jnp.sum(jnp.where(cls_ids == t, x, jnp.zeros((), x.dtype)),
                  axis=0, keepdims=True).astype(jnp.float32)

    loss = lse - tgt                                                   # (1, T)

    if mask_tail:
        px = j * tile_px + lax.broadcasted_iota(jnp.int32, loss.shape, 1)
        loss = jnp.where(px < hw, loss, 0.0)

    out_ref[...] = jnp.reshape(jnp.sum(loss), (1, 1, 1, 1))


def ce_loss(y_pred, y_true, *, max_tile_bytes=4 * 1024 * 1024):
    """Equivalent of nn.CrossEntropyLoss()(y_pred, y_true.squeeze(1).long())."""
    N, C, H, W = y_pred.shape
    HW = H * W
    itemsize = jnp.dtype(y_pred.dtype).itemsize

    # int8 labels whenever the classes fit (essentially all segmentation):
    # 4x less label HBM traffic; upcast to int32 inside the kernel.
    lbl_dtype = jnp.int8 if C <= 127 else jnp.int32

    if HW % 128 == 0:
        # ---- pixel-on-sublane layout: blocks (1, C, tile_rows, 128) ----
        HW128 = HW // 128
        x = y_pred.reshape(N, C, HW128, 128)                 # free reshape
        t = y_true.reshape(N, 1, HW128, 128).astype(lbl_dtype)

        # Rows of 128 pixels per tile; multiples of 32 keep the block legal
        # for f32/bf16 logits and int8 labels alike.
        cap_rows = max(32, ((max_tile_bytes // (C * itemsize * 128)) // 32) * 32)
        tile_rows = HW128 if HW128 <= cap_rows else cap_rows
        n_tiles = pl.cdiv(HW128, tile_rows)
        # Keep >= 2 grid steps so both TensorCores get work (megacore / v7x).
        if N * n_tiles < 2 and HW128 >= 64:
            tile_rows = (((HW128 + 1) // 2) + 31) // 32 * 32
            n_tiles = pl.cdiv(HW128, tile_rows)
        mask_tail = (HW128 % tile_rows) != 0

        kernel = functools.partial(_ce_kernel_pix, n_rows=HW128,
                                   tile_rows=tile_rows, mask_tail=mask_tail)
        in_specs = [
            pl.BlockSpec((1, C, tile_rows, 128), lambda n, j: (n, 0, j, 0)),
            pl.BlockSpec((1, 1, tile_rows, 128), lambda n, j: (n, 0, j, 0)),
        ]
    else:
        # ---- fallback: classes on sublanes, lane-dense pixel tiles ----
        x = y_pred.reshape(N, C, HW)
        t = y_true.reshape(N, 1, HW).astype(lbl_dtype)

        cap = max(128, ((max_tile_bytes // (C * itemsize)) // 128) * 128)
        tile_px = HW if HW <= cap else cap
        n_tiles = pl.cdiv(HW, tile_px)
        if N * n_tiles < 2 and HW >= 256:
            tile_px = (((HW + 1) // 2) + 127) // 128 * 128
            n_tiles = pl.cdiv(HW, tile_px)
        mask_tail = (HW % tile_px) != 0

        kernel = functools.partial(_ce_kernel_cls, hw=HW, tile_px=tile_px,
                                   mask_tail=mask_tail)
        in_specs = [
            pl.BlockSpec((1, C, tile_px), lambda n, j: (n, 0, j)),
            pl.BlockSpec((1, 1, tile_px), lambda n, j: (n, 0, j)),
        ]

    partials = pl.pallas_call(
        kernel,
        out_shape=jax.ShapeDtypeStruct((N, n_tiles, 1, 1), jnp.float32),
        grid=(N, n_tiles),
        in_specs=in_specs,
        out_specs=pl.BlockSpec((1, 1, 1, 1), lambda n, j: (n, j, 0, 0)),
        compiler_params=pltpu.CompilerParams(
            dimension_semantics=("parallel", "parallel"),
            # Safe on v5e/v6e/v7x (<= physical VMEM everywhere) while leaving
            # headroom for double-buffered ~4 MiB tiles + f32 intermediates.
            vmem_limit_bytes=32 * 1024 * 1024),
    )(x, t)

    return jnp.sum(partials) / jnp.float32(N * HW)


def _reference_ce(y_pred, y_true):
    """Pure-JAX reference for validation."""
    C = y_pred.shape[1]
    x = jnp.moveaxis(y_pred, 1, -1).reshape(-1, C).astype(jnp.float32)
    t = jnp.squeeze(y_true, axis=1).astype(jnp.int32).reshape(-1)
    logp = jax.nn.log_softmax(x, axis=-1)
    return -jnp.mean(jnp.take_along_axis(logp, t[:, None], axis=-1))


if __name__ == "__main__":
    key = jax.random.PRNGKey(0)
    k1, k2 = jax.random.split(key)

    N, C, H, W = 2, 4, 16, 16
    y_pred = jax.random.normal(k1, (N, C, H, W), dtype=jnp.float32)
    y_true = jax.random.randint(k2, (N, 1, H, W), 0, C, dtype=jnp.int32)

    loss = ce_loss(y_pred, y_true)
    loss = jax.block_until_ready(loss)

    ref = _reference_ce(y_pred, y_true)
    assert jnp.allclose(loss, ref, atol=1e-5, rtol=1e-5), (loss, ref)

    print("KERNEL_OK")
</pallas_src>

<mosaic_0001>
module attributes {stable_mosaic.version = 11 : i64} {
  func.func @_ce_kernel_pix(%arg0: i32, %arg1: i32, %arg2: memref<1x4x2x128xf32, #tpu.memory_space<vmem>>, %arg3: memref<1x1x2x128xi8, #tpu.memory_space<vmem>>, %arg4: memref<1x1x1x1xf32, #tpu.memory_space<vmem>>) attributes {dimension_semantics = [#tpu.dimension_semantics<parallel>, #tpu.dimension_semantics<parallel>], iteration_bounds = array<i64: 2, 1>, scalar_prefetch = 0 : i64, scratch_operands = 0 : i64, tpu.core_type = #tpu.core_type<tc>, window_params = [{transform_indices = @transform_0, window_bounds = array<i64: 1, 4, 2, 128>}, {transform_indices = @transform_1, window_bounds = array<i64: 1, 1, 2, 128>}, {transform_indices = @transform_2, window_bounds = array<i64: 1, 1, 1, 1>}]} {
    %c0 = arith.constant 0 : index
    %c0_0 = arith.constant 0 : index
    %c0_1 = arith.constant 0 : index
    %c0_2 = arith.constant 0 : index
    %0 = vector.load %arg2[%c0, %c0_0, %c0_1, %c0_2] : memref<1x4x2x128xf32, #tpu.memory_space<vmem>>, vector<1x4x2x128xf32>
    %1 = vector.shape_cast %0 : vector<1x4x2x128xf32> to vector<4x2x128xf32>
    %c0_3 = arith.constant 0 : index
    %c0_4 = arith.constant 0 : index
    %c0_5 = arith.constant 0 : index
    %c0_6 = arith.constant 0 : index
    %2 = vector.load %arg3[%c0_3, %c0_4, %c0_5, %c0_6] : memref<1x1x2x128xi8, #tpu.memory_space<vmem>>, vector<1x1x2x128xi8>
    %3 = vector.shape_cast %2 : vector<1x1x2x128xi8> to vector<2x128xi8>
    %4 = arith.extsi %3 : vector<2x128xi8> to vector<2x128xi32>
    %5 = vector.extract_strided_slice %1 {offsets = [0, 0, 0], sizes = [1, 2, 128], strides = [1, 1, 1]} : vector<4x2x128xf32> to vector<1x2x128xf32>
    %6 = vector.shape_cast %5 : vector<1x2x128xf32> to vector<2x128xf32>
    %7 = vector.extract_strided_slice %1 {offsets = [1, 0, 0], sizes = [1, 2, 128], strides = [1, 1, 1]} : vector<4x2x128xf32> to vector<1x2x128xf32>
    %8 = vector.shape_cast %7 : vector<1x2x128xf32> to vector<2x128xf32>
    %9 = arith.maximumf %6, %8 : vector<2x128xf32>
    %10 = vector.extract_strided_slice %1 {offsets = [2, 0, 0], sizes = [1, 2, 128], strides = [1, 1, 1]} : vector<4x2x128xf32> to vector<1x2x128xf32>
    %11 = vector.shape_cast %10 : vector<1x2x128xf32> to vector<2x128xf32>
    %12 = arith.maximumf %9, %11 : vector<2x128xf32>
    %13 = vector.extract_strided_slice %1 {offsets = [3, 0, 0], sizes = [1, 2, 128], strides = [1, 1, 1]} : vector<4x2x128xf32> to vector<1x2x128xf32>
    %14 = vector.shape_cast %13 : vector<1x2x128xf32> to vector<2x128xf32>
    %15 = arith.maximumf %12, %14 : vector<2x128xf32>
    %cst = arith.constant 0.000000e+00 : f32
    %16 = vector.broadcast %cst : f32 to vector<2x128xf32>
    %cst_7 = arith.constant 0.000000e+00 : f32
    %17 = vector.broadcast %cst_7 : f32 to vector<2x128xf32>
    %18 = vector.extract_strided_slice %1 {offsets = [0, 0, 0], sizes = [1, 2, 128], strides = [1, 1, 1]} : vector<4x2x128xf32> to vector<1x2x128xf32>
    %19 = vector.shape_cast %18 : vector<1x2x128xf32> to vector<2x128xf32>
    %20 = arith.subf %19, %15 : vector<2x128xf32>
    %21 = math.exp %20 : vector<2x128xf32>
    %22 = arith.addf %16, %21 : vector<2x128xf32>
    %c0_i32 = arith.constant 0 : i32
    %23 = vector.broadcast %c0_i32 : i32 to vector<2x128xi32>
    %24 = arith.cmpi eq, %4, %23 : vector<2x128xi32>
    %cst_8 = arith.constant 0.000000e+00 : f32
    %25 = vector.broadcast %cst_8 : f32 to vector<2x128xf32>
    %26 = arith.select %24, %19, %25 : vector<2x128xi1>, vector<2x128xf32>
    %27 = arith.addf %17, %26 : vector<2x128xf32>
    %28 = vector.extract_strided_slice %1 {offsets = [1, 0, 0], sizes = [1, 2, 128], strides = [1, 1, 1]} : vector<4x2x128xf32> to vector<1x2x128xf32>
    %29 = vector.shape_cast %28 : vector<1x2x128xf32> to vector<2x128xf32>
    %30 = arith.subf %29, %15 : vector<2x128xf32>
    %31 = math.exp %30 : vector<2x128xf32>
    %32 = arith.addf %22, %31 : vector<2x128xf32>
    %c1_i32 = arith.constant 1 : i32
    %33 = vector.broadcast %c1_i32 : i32 to vector<2x128xi32>
    %34 = arith.cmpi eq, %4, %33 : vector<2x128xi32>
    %cst_9 = arith.constant 0.000000e+00 : f32
    %35 = vector.broadcast %cst_9 : f32 to vector<2x128xf32>
    %36 = arith.select %34, %29, %35 : vector<2x128xi1>, vector<2x128xf32>
    %37 = arith.addf %27, %36 : vector<2x128xf32>
    %38 = vector.extract_strided_slice %1 {offsets = [2, 0, 0], sizes = [1, 2, 128], strides = [1, 1, 1]} : vector<4x2x128xf32> to vector<1x2x128xf32>
    %39 = vector.shape_cast %38 : vector<1x2x128xf32> to vector<2x128xf32>
    %40 = arith.subf %39, %15 : vector<2x128xf32>
    %41 = math.exp %40 : vector<2x128xf32>
    %42 = arith.addf %32, %41 : vector<2x128xf32>
    %c2_i32 = arith.constant 2 : i32
    %43 = vector.broadcast %c2_i32 : i32 to vector<2x128xi32>
    %44 = arith.cmpi eq, %4, %43 : vector<2x128xi32>
    %cst_10 = arith.constant 0.000000e+00 : f32
    %45 = vector.broadcast %cst_10 : f32 to vector<2x128xf32>
    %46 = arith.select %44, %39, %45 : vector<2x128xi1>, vector<2x128xf32>
    %47 = arith.addf %37, %46 : vector<2x128xf32>
    %48 = vector.extract_strided_slice %1 {offsets = [3, 0, 0], sizes = [1, 2, 128], strides = [1, 1, 1]} : vector<4x2x128xf32> to vector<1x2x128xf32>
    %49 = vector.shape_cast %48 : vector<1x2x128xf32> to vector<2x128xf32>
    %50 = arith.subf %49, %15 : vector<2x128xf32>
    %51 = math.exp %50 : vector<2x128xf32>
    %52 = arith.addf %42, %51 : vector<2x128xf32>
    %c3_i32 = arith.constant 3 : i32
    %53 = vector.broadcast %c3_i32 : i32 to vector<2x128xi32>
    %54 = arith.cmpi eq, %4, %53 : vector<2x128xi32>
    %cst_11 = arith.constant 0.000000e+00 : f32
    %55 = vector.broadcast %cst_11 : f32 to vector<2x128xf32>
    %56 = arith.select %54, %49, %55 : vector<2x128xi1>, vector<2x128xf32>
    %57 = arith.addf %47, %56 : vector<2x128xf32>
    %58 = math.log %52 : vector<2x128xf32>
    %59 = arith.addf %15, %58 : vector<2x128xf32>
    %60 = arith.subf %59, %57 : vector<2x128xf32>
    %61 = vector.shape_cast %60 : vector<2x128xf32> to vector<1x2x128xf32>
    %cst_12 = arith.constant dense<0.000000e+00> : vector<1xf32>
    %62 = vector.multi_reduction <add>, %61, %cst_12 [1, 2] : vector<1x2x128xf32> to vector<1xf32>
    %63 = vector.shape_cast %62 : vector<1xf32> to vector<1x1x1xf32>
    %64 = vector.extract %63[0, 0, 0] : f32 from vector<1x1x1xf32>
    %65 = vector.broadcast %64 : f32 to vector<1x1x1x1xf32>
    %c0_13 = arith.constant 0 : index
    %c0_14 = arith.constant 0 : index
    %c0_15 = arith.constant 0 : index
    %c0_16 = arith.constant 0 : index
    %66 = vector.load %arg4[%c0_13, %c0_14, %c0_15, %c0_16] : memref<1x1x1x1xf32, #tpu.memory_space<vmem>>, vector<1x1x1x1xf32>
    tpu.vector_store %arg4[%c0_13, %c0_14, %c0_15, %c0_16], %65 {strides = array<i32>} : memref<1x1x1x1xf32, #tpu.memory_space<vmem>>, vector<1x1x1x1xf32>,
    return
  }
  func.func @transform_0(%arg0: i32, %arg1: i32) -> (i32, i32, i32, i32) {
    %c0_i32 = arith.constant 0 : i32
    %c0_i32_0 = arith.constant 0 : i32
    %c0_i32_1 = arith.constant 0 : i32
    return %arg0, %c0_i32, %arg1, %c0_i32_0 : i32, i32, i32, i32
  }
  func.func @transform_1(%arg0: i32, %arg1: i32) -> (i32, i32, i32, i32) {
    %c0_i32 = arith.constant 0 : i32
    %c0_i32_0 = arith.constant 0 : i32
    %c0_i32_1 = arith.constant 0 : i32
    return %arg0, %c0_i32, %arg1, %c0_i32_0 : i32, i32, i32, i32
  }
  func.func @transform_2(%arg0: i32, %arg1: i32) -> (i32, i32, i32, i32) {
    %c0_i32 = arith.constant 0 : i32
    %c0_i32_0 = arith.constant 0 : i32
    %c0_i32_1 = arith.constant 0 : i32
    return %arg0, %arg1, %c0_i32, %c0_i32_0 : i32, i32, i32, i32
  }
}

</mosaic_0001>

<bundles_post_ra>
// kernel: tpu_custom_call.1
= control target key start
LH: loop header
LB: loop body
LE: loop exit
PB: predicated region body
PF: predicated region fallthrough
CT: control target
= control target key end

     0   :  { %7 = vsyncpa [#allocation3], 0  ;;  %s723_s0 = inlined_call_operand.hbm [shape: f32[2,4,2,128], index: 0, kind: input, shape index: {}]   ;;  %s724_s1 = inlined_call_operand.hbm [shape: s8[2,1,2,128], index: 1, kind: input, shape index: {}]   ;;  %s725_s2 = inlined_call_operand.vmem [shape: f32[2,1,1,1], index: 2, kind: output, shape index: {}]  }
   0x1   :  { %9 = vsyncpa [#allocation3 + $0x1], 0 }
   0x2   :  { %10 = vsyncpa [#allocation5], 0 }
   0x3   :  { %12 = vsyncpa [#allocation5 + $0x1], 0  ;;  %s593_s9 = smov 0   ;;  %s595_s10 = smov 0  }
   0x4   :  { %s597_s11 = smov 0   ;;  %s599_s12 = smov 0  }
   0x5   :  { %s601_s13 = smov 0   ;;  %s603_s14 = smov 0  }
   0x6 LB: > { %s375_s15 = sadd.s32 4294967295, %s572_s14   ;;  %s30_s16 = sadd.s32 1, %s568_s13  ;;  %s572_s14 = sphi %s603_s14, %s18_s14   ;;  %s568_s13 = sphi %s601_s13, %s734_s13   ;;  %s564_s12 = sphi %s599_s12, %s733_s12   ;;  %s560_s11 = sphi %s597_s11, %s732_s11   ;;  %s556_s10 = sphi %s595_s10, %s731_s10   ;;  %s552_s9 = sphi %s593_s9, %s730_s9  }
   0x7   : > { %p32_p0 = scmp.ge.s32.totalorder %s30_s16, 2  ;;  %s39_s17 = sadd.s32 1, %s560_s11 }
   0x8   : > { %p46_p1 = scmp.ne.s32.totalorder %s560_s11, %s556_s10  ;;  %p47_p2 = scmp.eq.s32.totalorder %s572_s14, 0 }
   0x9   : > { %s736_s16 = smov (%p32_p0, %s30_s16), 0  ;;  %p52_p4 = scmp.ne.s32.totalorder %s556_s10, %s552_s9 }
   0xa   : > { %p629_p3 = por %p47_p2, %p46_p1  ;;  %s34_s19 = ssub.s32 %s568_s13, %s736_s16 }
   0xb   : > { %p53_p5 = scmp.eq.s32.totalorder %s375_s15, 0  ;;  %p37_p6 = scmp.eq.s32.totalorder %s34_s19, 0 }
   0xc   : > { %p401_p8 = scmp.lt.s32.totalorder %s572_s14, 2  ;;  %s645_s22 = sand.u32 1, %s560_s11  }
   0xd   : > { %p636_p7 = por %p53_p5, %p52_p4  ;;  %s387_s23 = sshll.u32 %s568_s13, 7 }
   0xe   : > { %s642_s21 = scalar_select %p37_p6, %s560_s11, %s39_s17  }
   0xf   : > { %s379_s24 = sshll.u32 %s645_s22, 3  ;;  %s143_s27 = scalar_lea.hbm %s723_s0, %s387_s23 }
  0x10   : > { %s136_s28 = scalar_lea.vmem [#allocation2], %s379_s24  ;;  %p654_p9 = pnand %p401_p8, %p629_p3 }
  0x11   : > { %s144_s29 = sshll.u32 %s136_s28, 4  ;;  %s133_s3 = scalar_lea.sflag [#allocation3], %s645_s22  ;;  %s145_s29 = int_to_ptr.vmem [resolvable:$true] %s144_s29 }
  0x12   : > { %p464_p10 = pneg %p654_p9  ;;  %s475_s4 = scalar_lea.vmem %s145_s29, 128 }
  0x13   : > { %p476_p11 = scmp.ne.s32.totalorder %s145_s29, %s475_s4  ;;  %s574_s5 = smov [#allocation2]  }
  0x14   : > { %s480_s6 = sshll.u32 %s574_s5, 4  ;;  %s481_s6 = int_to_ptr.vmem [resolvable:$false] %s480_s6 }
  0x15   : > { %p478_p12 = pnand %p476_p11, %p464_p10  ;;  %s482_s7 = scalar_lea.vmem %s481_s6, 256 }
  0x16   : > { %p483_p0 = scmp.lt.s32.totalorder %s145_s29, %s481_s6  ;;  %p484_p1 = scmp.lt.s32.totalorder %s482_s7, %s475_s4 }
  0x17   : > { %p479_p13 = pneg %p478_p12 }
  0x18   : > { %p485_p2 = por %p484_p1, %p483_p0 }
  0x1a   : > { %p486_p3 = pnand %p485_p2, %p479_p13 }
  0x1c   : > { %489 = shalt.err (!%p486_p3)
}
  0x1d   : > { %s575_s8 = smov 32   ;;  %s576_s9 = smov 2  }
  0x1e   : > { %397 = dma.hbm_to_vmem [thread:$0]  (!%p654_p9), %s143_s27, 128, %s145_s29, %s133_s3, %s575_s8, %s575_s8, %s576_s9  }
  0x1f   : > { %p383_p4 = scmp.ge.s32.totalorder %s572_s14, 1  ;;  %p170_p5 = scmp.lt.s32.totalorder %s572_s14, 3 }
  0x20   : > { %s382_s17 = sshll.u32 %s568_s13, 4  ;;  %s157_s24 = scalar_lea.vmem [#allocation4], %s645_s22 }
  0x21   : > { %p668_p6 = pnand %p383_p4, %p170_p5  ;;  %s163_s23 = scalar_lea.hbm %s724_s1, %s382_s17 }
  0x22   : > { %s165_s25 = sshll.u32 %s157_s24, 4  ;;  %s155_s26 = scalar_lea.sflag [#allocation5], %s645_s22  ;;  %s166_s25 = int_to_ptr.vmem [resolvable:$true] %s165_s25 }
  0x23   : > { %s503_s28 = scalar_lea.vmem %s166_s25, 16  ;;  %s577_s27 = smov [#allocation4]  }
  0x24   : > { %p504_p8 = scmp.ne.s32.totalorder %s166_s25, %s503_s28  ;;  %s508_s29 = sshll.u32 %s577_s27, 4  ;;  %s509_s29 = int_to_ptr.vmem [resolvable:$false] %s508_s29 }
  0x25   : > { %s510_s3 = scalar_lea.vmem %s509_s29, 32  ;;  %p511_p13 = scmp.lt.s32.totalorder %s166_s25, %s509_s29 }
  0x26   : > { %p506_p11 = pnand %p504_p8, %p464_p10  ;;  %p512_p0 = scmp.lt.s32.totalorder %s510_s3, %s503_s28 }
  0x28   : > { %p507_p12 = pneg %p506_p11  ;;  %p513_p1 = por %p512_p0, %p511_p13 }
  0x2a   : > { %p514_p2 = pnand %p513_p1, %p507_p12 }
  0x2c   : > { %517 = shalt.err (!%p514_p2)
}
  0x2d   : > { %400 = dma.hbm_to_vmem [thread:$0]  (!%p654_p9), %s163_s23, 16, %s166_s25, %s155_s26  }
  0x2e   : > { %174 = sbr.rel (%p668_p6) target bundleno = 309 (0x135), region = 28  ;;  %s686_s22 = sand.u32 (!%p668_p6), 1, %s556_s10  }
  0x2f   : > { %s384_s4 = sshll.u32 (!%p668_p6), %s686_s22, 3  ;;  %s177_s5 = scalar_lea.sflag (!%p668_p6), [#allocation3], %s686_s22 }
  0x30   : > { %s180_s6 = scalar_lea.vmem (!%p668_p6), [#allocation2], %s384_s4 }
  0x33   : > { %543 = dma.done.wait (%p636_p7), %s177_s5, 128  }
  0x34   : > { %545 = vsyncadd (%p636_p7), %s177_s5, 4294967168  ;;  %s186_s30 = scalar_lea.sflag [#allocation5], %s686_s22  ;;  %s188_s7 = scalar_lea.vmem [#allocation4], %s686_s22 }
  0x35   : > { %547 = dma.done.wait (%p636_p7), %s186_s30, 16  }
  0x36   : > { %549 = vsyncadd (%p636_p7), %s186_s30, 4294967280  ;;  %v220_v0 = vld [vmem:[%s180_s6] sm:$0x3]  ;;  %v221_v1 = vld [vmem:[%s180_s6 + $0x2] sm:$0x3]  ;;  %vm261_vm4 = vcmask 1041408  }
  0x37   : > { %v222_v2 = vld [vmem:[%s180_s6 + $0x4] sm:$0x3]  ;;  %v226_v3 = vmax.f32 %v220_v0, %v221_v1  ;;  %v223_v4 = vld [vmem:[%s180_s6 + $0x6] sm:$0x3]  ;;  %v224_v17 = vld [vmem:[%s188_s7] sm:$0x1] }
  0x38   : > { %v225_v21 = vunpack.c.0.s8 %v224_v17  ;;  %p214_p7 = scmp.lt.s32.totalorder %s564_s12, 1  ;;  %vm273_vm5 = vcmask 0  }
  0x39   : > { %v227_v5 = vmax.f32 %v226_v3, %v222_v2 }
  0x3a   : > { %vm233_vm0 = vcmp.eq.s32.totalorder %v225_v21, 0  ;;  %vm240_vm1 = vcmp.eq.s32.totalorder %v225_v21, 1  ;;  %vm247_vm2 = vcmp.eq.s32.totalorder %v225_v21, 2  ;;  %vm254_vm3 = vcmp.eq.s32.totalorder %v225_v21, 3  ;;  %s738_s12 = smov (!%p214_p7, %s564_s12), 1 }
  0x3b   : > { %v228_v6 = vmax.f32 %v227_v5, %v223_v4  ;;  %v234_v24 = vsel %vm233_vm0, %v220_v0, 0.0  ;;  %v241_v25 = vsel %vm240_vm1, %v221_v1, 0.0  ;;  %v248_v27 = vsel %vm247_vm2, %v222_v2, 0.0  ;;  %s219_s9 = scalar_lea.vmem %s725_s2, %s738_s12 }
  0x3c   : > { %v242_v26 = vadd.f32 %v241_v25, %v234_v24  ;;  %v255_v29 = vsel %vm254_vm3, %v223_v4, 0.0 }
  0x3d   : > { %v229_v7 = vsub.f32 %v220_v0, %v228_v6  ;;  %v236_v8 = vsub.f32 %v221_v1, %v228_v6  ;;  %v243_v9 = vsub.f32 %v222_v2, %v228_v6  ;;  %v250_v10 = vsub.f32 %v223_v4, %v228_v6 }
  0x3e   : > { %v249_v28 = vadd.f32 %v248_v27, %v242_v26 }
  0x3f   : > { %v230_v11 = vmul.f32 1.442695, %v229_v7  ;;  %v237_v12 = vmul.f32 1.442695, %v236_v8  ;;  %v244_v13 = vmul.f32 1.442695, %v243_v9 }
  0x40   : > { %v251_v14 = vmul.f32 1.442695, %v250_v10  ;;  %v256_v31 = vadd.f32 %v255_v29, %v249_v28 }
  0x41   : > { %452 = vpow2.f32 %v230_v11 }
  0x42   : > { %454 = vpow2.f32 %v237_v12 }
  0x43   : > { %456 = vpow2.f32 %v244_v13 }
  0x44   : > { %458 = vpow2.f32 %v251_v14 }
  0x4e   : > { %v453_v15 = vpop.eup %452 }
  0x4f   : > { %v455_v16 = vpop.eup %454 }
  0x50   : > { %v457_v18 = vpop.eup %456  ;;  %v239_v19 = vadd.f32 %v455_v16, %v453_v15 }
  0x51   : > { %v459_v20 = vpop.eup %458 }
  0x52   : > { %v246_v22 = vadd.f32 %v457_v18, %v239_v19 }
  0x54   : > { %v253_v23 = vadd.f32 %v459_v20, %v246_v22 }
  0x56   : > { %460 = vlog2.f32 %v253_v23 }
  0x63   : > { %v461_v30 = vpop.eup %460 }
  0x64   : > { %v258_v32 = vmul.f32 0.6931472, %v461_v30 }
  0x66   : > { %v259_v33 = vadd.f32 %v258_v32, %v228_v6 }
  0x68   : > { %v260_v34 = vsub.f32 %v259_v33, %v256_v31 }
  0x6a   : > { %v262_v35 = vsel %vm261_vm4, %v260_v34, 0.0 }
  0x6b   : > { %263 = vadd.xlane.f32.xlu0 %v262_v35 }
  0xf4   : > { %v264_v36 = vpop.xlane.xlu0 %263 }
  0xf5   : > { %v265_v37 = vrot.slane %v264_v36, 4 }
  0xf7   : > { %v266_v38 = vadd.f32 %v265_v37, %v264_v36 }
  0xf9   : > { %v267_v39 = vrot.slane %v266_v38, 2 }
  0xfb   : > { %v268_v40 = vadd.f32 %v267_v39, %v266_v38 }
  0xfd   : > { %v269_v41 = vrot.slane %v268_v40, 1 }
  0xff   : > { %v270_v42 = vadd.f32 %v269_v41, %v268_v40 }
 0x101   : > { %388 = vpush %v270_v42 }
 0x132   : > { %s389_s15 = spop %388 }
 0x133   : > { %v272_v43 = vstv %s389_s15 }
 0x134   : > { %274 = vst.msk [vmem:[%s219_s9] sm:$0x1] %vm273_vm5, %v272_v43 }
 0x135 PF: > { %s18_s14 = sadd.s32 1, %s572_s14   ;;  %s730_s9 = smov %s556_s10 }
 0x136   : > { %p15_p9 = scmp.ge.s32.totalorder %s18_s14, 4   ;;  %s731_s10 = smov %s560_s11 }
 0x137   : > { %s732_s11 = smov %s642_s21  ;;  %s733_s12 = smov %s568_s13 }
 0x138   : > { %s734_s13 = smov %s736_s16  ;;  %17 = sbr.rel (!%p15_p9) target bundleno = 6 (0x6), region = 81 }
 0x13d   :  { %298 = vsyncpa [#allocation3], 1 }
 0x13e   :  { %300 = vsyncpa [#allocation3 + $0x1], 1 }
 0x13f   :  { %301 = vsyncpa [#allocation5], 1 }
 0x140   :  { %303 = vsyncpa [#allocation5 + $0x1], 1 }

</bundles_post_ra>
